<compile_context>
chip_gen: v6e
topology: v6e:2x2x1
jax: 0.10.0
libtpu: 0.0.40
codegen_flags: <defaults>
</compile_context>

<pallas_src>
import functools

import jax
import jax.numpy as jnp
from jax.experimental import pallas as pl
from jax.experimental.pallas import tpu as pltpu

_LANE = 128
_SUBLANE = 8


def _round_up(x, m):
    return ((x + m - 1) // m) * m


def _hardswish(x):
    # PyTorch Hardswish: x * relu6(x + 3) / 6
    return x * jnp.clip(x + 3.0, 0.0, 6.0) * (1.0 / 6.0)


def _actor_mlp_kernel(x_ref,
                      w1_ref, b1_ref,
                      w2_ref, b2_ref,
                      w3_ref, b3_ref,
                      w4_ref, b4_ref,
                      o_ref):
    # bf16 LHS/RHS on the MXU with f32 accumulation; bias/activations in f32.
    x = x_ref[...]

    # Layer 1: Linear + ReLU
    h = jnp.dot(x, w1_ref[...], preferred_element_type=jnp.float32) + b1_ref[...]
    h = jnp.maximum(h, 0.0)

    # Layer 2: Linear + ReLU
    h = jnp.dot(h.astype(jnp.bfloat16), w2_ref[...],
                preferred_element_type=jnp.float32) + b2_ref[...]
    h = jnp.maximum(h, 0.0)

    # Layer 3: Linear + Hardswish
    h = jnp.dot(h.astype(jnp.bfloat16), w3_ref[...],
                preferred_element_type=jnp.float32) + b3_ref[...]
    h = _hardswish(h)

    # Layer 4: Linear (action mean head), lane-padded output columns
    out = jnp.dot(h.astype(jnp.bfloat16), w4_ref[...],
                  preferred_element_type=jnp.float32) + b4_ref[...]
    o_ref[...] = out.astype(o_ref.dtype)


@functools.partial(jax.jit, static_argnames=("block_b_max",))
def actor_ppo_forward(states, params, *, block_b_max=256):
    """Fused MLP forward. states: [B, state_dim] (f32) -> [B, action_dim] (f32)."""
    w1, b1, w2, b2, w3, b3, w4, b4 = params
    B, S = states.shape
    M = w1.shape[1]
    A = w4.shape[1]

    # Pad every feature dim to a multiple of 128 lanes (exact: zero padding).
    S_pad = _round_up(S, _LANE)
    M_pad = _round_up(M, _LANE)
    A_pad = _round_up(A, _LANE)

    # Adaptive batch tiling: number of tiles from the max tile size, then the
    # smallest sublane-rounded tile that covers B (minimizes padded rows).
    n_tiles = max(1, -(-B // block_b_max))            # cdiv(B, block_b_max)
    block_b = _round_up(-(-B // n_tiles), _SUBLANE)   # cdiv(B, n_tiles) -> x8
    B_pad = n_tiles * block_b
    grid = (n_tiles,)

    f32, bf16 = jnp.float32, jnp.bfloat16

    def pad2(a, rows, cols, dtype):
        r, c = a.shape
        return jnp.pad(a.astype(f32), ((0, rows - r), (0, cols - c))).astype(dtype)

    x_p = pad2(states, B_pad, S_pad, bf16)
    w1_p = pad2(w1, S_pad, M_pad, bf16)
    b1_p = pad2(b1, 1, M_pad, f32)
    w2_p = pad2(w2, M_pad, M_pad, bf16)
    b2_p = pad2(b2, 1, M_pad, f32)
    w3_p = pad2(w3, M_pad, M_pad, bf16)
    b3_p = pad2(b3, 1, M_pad, f32)
    w4_p = pad2(w4, M_pad, A_pad, bf16)
    b4_p = pad2(b4, 1, A_pad, f32)

    # Batch dimension tiled across the grid; weights/biases resident (constant
    # index_map -> same block every grid step, only DMA'd once).
    in_specs = [
        pl.BlockSpec((block_b, S_pad), lambda i: (i, 0)),   # states
        pl.BlockSpec((S_pad, M_pad), lambda i: (0, 0)),     # w1
        pl.BlockSpec((1, M_pad), lambda i: (0, 0)),         # b1
        pl.BlockSpec((M_pad, M_pad), lambda i: (0, 0)),     # w2
        pl.BlockSpec((1, M_pad), lambda i: (0, 0)),         # b2
        pl.BlockSpec((M_pad, M_pad), lambda i: (0, 0)),     # w3
        pl.BlockSpec((1, M_pad), lambda i: (0, 0)),         # b3
        pl.BlockSpec((M_pad, A_pad), lambda i: (0, 0)),     # w4
        pl.BlockSpec((1, A_pad), lambda i: (0, 0)),         # b4
    ]
    out_spec = pl.BlockSpec((block_b, A_pad), lambda i: (i, 0))

    # Advisory cost estimate so XLA schedules this call sensibly relative to
    # the surrounding PPO sampling / logprob math.
    flops = 2 * B_pad * (S_pad * M_pad + 2 * M_pad * M_pad + M_pad * A_pad)
    weight_bytes = 2 * (S_pad * M_pad + 2 * M_pad * M_pad + M_pad * A_pad)   # bf16
    bias_bytes = 4 * (3 * M_pad + A_pad)                                     # f32
    bytes_accessed = (B_pad * S_pad * 2) + weight_bytes + bias_bytes + (B_pad * A_pad * 4)
    cost = pl.CostEstimate(flops=flops, transcendentals=0,
                           bytes_accessed=bytes_accessed)

    # VMEM budget: double-buffered blocks + f32 activation tiles + slack.
    # Capped at 64 MiB so the same tiling stays valid on v7x (64 MiB physical).
    per_step_bytes = (block_b * S_pad * 2) + weight_bytes + bias_bytes + (block_b * A_pad * 4)
    vmem_limit = int(min(max(2 * per_step_bytes + 6 * block_b * M_pad * 4 + (4 << 20),
                             16 << 20),
                         64 << 20))

    out_padded = pl.pallas_call(
        _actor_mlp_kernel,
        out_shape=jax.ShapeDtypeStruct((B_pad, A_pad), jnp.float32),
        grid_spec=pltpu.PrefetchScalarGridSpec(
            num_scalar_prefetch=0,
            grid=grid,
            in_specs=in_specs,
            out_specs=out_spec,
        ),
        compiler_params=pltpu.CompilerParams(
            dimension_semantics=("parallel",),
            vmem_limit_bytes=vmem_limit,
        ),
        cost_estimate=cost,
    )(x_p, w1_p, b1_p, w2_p, b2_p, w3_p, b3_p, w4_p, b4_p)

    return out_padded[:B, :A]


def init_actor_ppo_params(key, state_dim, action_dim, mid_dim):
    """Deterministic synthetic init. Weights stored as [in, out] (pre-transposed)."""
    ks = jax.random.split(key, 8)

    def lin(kw, kb, fan_in, fan_out):
        bound = 1.0 / jnp.sqrt(jnp.float32(fan_in))
        w = jax.random.uniform(kw, (fan_in, fan_out), jnp.float32, -bound, bound)
        b = jax.random.uniform(kb, (1, fan_out), jnp.float32, -bound, bound)
        return w, b

    w1, b1 = lin(ks[0], ks[1], state_dim, mid_dim)
    w2, b2 = lin(ks[2], ks[3], mid_dim, mid_dim)
    w3, b3 = lin(ks[4], ks[5], mid_dim, mid_dim)
    w4, b4 = lin(ks[6], ks[7], mid_dim, action_dim)
    # action_std_log parameter exists in the module but is unused in forward().
    _action_std_log = jnp.zeros((1, action_dim), jnp.float32) - 0.5  # noqa: F841
    return (w1, b1, w2, b2, w3, b3, w4, b4)


def _reference_forward(states, params, use_bf16):
    """Pure-JAX reference; `use_bf16=True` mirrors the kernel's matmul dtype."""
    w1, b1, w2, b2, w3, b3, w4, b4 = params
    dt = jnp.bfloat16 if use_bf16 else jnp.float32

    def mm(x, w):
        return jnp.dot(x.astype(dt), w.astype(dt),
                       preferred_element_type=jnp.float32)

    h = jnp.maximum(mm(states, w1) + b1, 0.0)
    h = jnp.maximum(mm(h, w2) + b2, 0.0)
    h = _hardswish(mm(h, w3) + b3)
    return mm(h, w4) + b4


def _check(batch, state_dim, action_dim, mid_dim, key):
    k_params, k_states = jax.random.split(key)
    params = init_actor_ppo_params(k_params, state_dim, action_dim, mid_dim)
    states = jax.random.normal(k_states, (batch, state_dim), jnp.float32)

    out = actor_ppo_forward(states, params, block_b_max=256)
    out = jax.block_until_ready(out)

    ref_bf16 = _reference_forward(states, params, use_bf16=True)
    ref_f32 = _reference_forward(states, params, use_bf16=False)

    assert out.shape == (batch, action_dim)
    assert jnp.allclose(out, ref_bf16, atol=5e-3, rtol=5e-3), "mismatch vs bf16 reference"
    assert jnp.allclose(out, ref_f32, atol=5e-2, rtol=5e-2), "mismatch vs f32 reference"


if __name__ == "__main__":
    key = jax.random.PRNGKey(0)
    k1, k2 = jax.random.split(key)

    # Small shapes consistent with the module; batches are deliberately NOT
    # multiples of 8/128/256 to exercise the ragged-batch padding paths.
    state_dim = 16
    action_dim = 4
    mid_dim = 128     # small stand-in for the module's default 512

    _check(batch=48, state_dim=state_dim, action_dim=action_dim,
           mid_dim=mid_dim, key=k1)                       # single-tile grid
    _check(batch=300, state_dim=state_dim, action_dim=action_dim,
           mid_dim=mid_dim, key=k2)                       # multi-tile grid

    # TODO(synk): get_action / get_*_logprob (sampling + Gaussian logprob/entropy)
    # are loss-side helpers, not part of forward(); left to plain JAX.
    print("KERNEL_OK")
</pallas_src>

<mosaic_0001>
module attributes {stable_mosaic.version = 11 : i64} {
  func.func @_actor_mlp_kernel(%arg0: i32, %arg1: memref<48x128xbf16, #tpu.memory_space<vmem>>, %arg2: memref<128x128xbf16, #tpu.memory_space<vmem>>, %arg3: memref<1x128xf32, #tpu.memory_space<vmem>>, %arg4: memref<128x128xbf16, #tpu.memory_space<vmem>>, %arg5: memref<1x128xf32, #tpu.memory_space<vmem>>, %arg6: memref<128x128xbf16, #tpu.memory_space<vmem>>, %arg7: memref<1x128xf32, #tpu.memory_space<vmem>>, %arg8: memref<128x128xbf16, #tpu.memory_space<vmem>>, %arg9: memref<1x128xf32, #tpu.memory_space<vmem>>, %arg10: memref<48x128xf32, #tpu.memory_space<vmem>>) attributes {dimension_semantics = [#tpu.dimension_semantics<parallel>], iteration_bounds = array<i64: 1>, scalar_prefetch = 0 : i64, scratch_operands = 0 : i64, tpu.core_type = #tpu.core_type<tc>, window_params = [{transform_indices = @transform_0, window_bounds = array<i64: 48, 128>}, {pipeline_mode = #tpu.pipeline_mode<synchronous>, transform_indices = @transform_1, window_bounds = array<i64: 128, 128>}, {pipeline_mode = #tpu.pipeline_mode<synchronous>, transform_indices = @transform_2, window_bounds = array<i64: 1, 128>}, {pipeline_mode = #tpu.pipeline_mode<synchronous>, transform_indices = @transform_3, window_bounds = array<i64: 128, 128>}, {pipeline_mode = #tpu.pipeline_mode<synchronous>, transform_indices = @transform_4, window_bounds = array<i64: 1, 128>}, {pipeline_mode = #tpu.pipeline_mode<synchronous>, transform_indices = @transform_5, window_bounds = array<i64: 128, 128>}, {pipeline_mode = #tpu.pipeline_mode<synchronous>, transform_indices = @transform_6, window_bounds = array<i64: 1, 128>}, {pipeline_mode = #tpu.pipeline_mode<synchronous>, transform_indices = @transform_7, window_bounds = array<i64: 128, 128>}, {pipeline_mode = #tpu.pipeline_mode<synchronous>, transform_indices = @transform_8, window_bounds = array<i64: 1, 128>}, {transform_indices = @transform_9, window_bounds = array<i64: 48, 128>}]} {
    %c0 = arith.constant 0 : index
    %c0_0 = arith.constant 0 : index
    %0 = vector.load %arg1[%c0, %c0_0] : memref<48x128xbf16, #tpu.memory_space<vmem>>, vector<48x128xbf16>
    %c0_1 = arith.constant 0 : index
    %c0_2 = arith.constant 0 : index
    %1 = vector.load %arg2[%c0_1, %c0_2] : memref<128x128xbf16, #tpu.memory_space<vmem>>, vector<128x128xbf16>
    %cst = arith.constant dense<0.000000e+00> : vector<48x128xf32>
    %2 = tpu.matmul %0, %1, %cst {dimension_numbers = #tpu.dot_dimension_numbers<[1], [0], [0], [1], [0, 0, 1, 1], [], []>} : vector<48x128xbf16>, vector<128x128xbf16>, vector<48x128xf32> -> vector<48x128xf32>
    %c0_3 = arith.constant 0 : index
    %c0_4 = arith.constant 0 : index
    %3 = vector.load %arg3[%c0_3, %c0_4] : memref<1x128xf32, #tpu.memory_space<vmem>>, vector<1x128xf32>
    %4 = vector.broadcast %3 : vector<1x128xf32> to vector<48x128xf32>
    %5 = arith.addf %2, %4 : vector<48x128xf32>
    %cst_5 = arith.constant 0.000000e+00 : f32
    %6 = vector.broadcast %cst_5 : f32 to vector<48x128xf32>
    %7 = arith.maximumf %5, %6 : vector<48x128xf32>
    %8 = arith.truncf %7 : vector<48x128xf32> to vector<48x128xbf16>
    %c0_6 = arith.constant 0 : index
    %c0_7 = arith.constant 0 : index
    %9 = vector.load %arg4[%c0_6, %c0_7] : memref<128x128xbf16, #tpu.memory_space<vmem>>, vector<128x128xbf16>
    %cst_8 = arith.constant dense<0.000000e+00> : vector<48x128xf32>
    %10 = tpu.matmul %8, %9, %cst_8 {dimension_numbers = #tpu.dot_dimension_numbers<[1], [0], [0], [1], [0, 0, 1, 1], [], []>} : vector<48x128xbf16>, vector<128x128xbf16>, vector<48x128xf32> -> vector<48x128xf32>
    %c0_9 = arith.constant 0 : index
    %c0_10 = arith.constant 0 : index
    %11 = vector.load %arg5[%c0_9, %c0_10] : memref<1x128xf32, #tpu.memory_space<vmem>>, vector<1x128xf32>
    %12 = vector.broadcast %11 : vector<1x128xf32> to vector<48x128xf32>
    %13 = arith.addf %10, %12 : vector<48x128xf32>
    %cst_11 = arith.constant 0.000000e+00 : f32
    %14 = vector.broadcast %cst_11 : f32 to vector<48x128xf32>
    %15 = arith.maximumf %13, %14 : vector<48x128xf32>
    %16 = arith.truncf %15 : vector<48x128xf32> to vector<48x128xbf16>
    %c0_12 = arith.constant 0 : index
    %c0_13 = arith.constant 0 : index
    %17 = vector.load %arg6[%c0_12, %c0_13] : memref<128x128xbf16, #tpu.memory_space<vmem>>, vector<128x128xbf16>
    %cst_14 = arith.constant dense<0.000000e+00> : vector<48x128xf32>
    %18 = tpu.matmul %16, %17, %cst_14 {dimension_numbers = #tpu.dot_dimension_numbers<[1], [0], [0], [1], [0, 0, 1, 1], [], []>} : vector<48x128xbf16>, vector<128x128xbf16>, vector<48x128xf32> -> vector<48x128xf32>
    %c0_15 = arith.constant 0 : index
    %c0_16 = arith.constant 0 : index
    %19 = vector.load %arg7[%c0_15, %c0_16] : memref<1x128xf32, #tpu.memory_space<vmem>>, vector<1x128xf32>
    %20 = vector.broadcast %19 : vector<1x128xf32> to vector<48x128xf32>
    %21 = arith.addf %18, %20 : vector<48x128xf32>
    %cst_17 = arith.constant 3.000000e+00 : f32
    %22 = vector.broadcast %cst_17 : f32 to vector<48x128xf32>
    %23 = arith.addf %21, %22 : vector<48x128xf32>
    %cst_18 = arith.constant 0.000000e+00 : f32
    %cst_19 = arith.constant 6.000000e+00 : f32
    %24 = vector.broadcast %cst_18 : f32 to vector<48x128xf32>
    %25 = arith.maximumf %24, %23 : vector<48x128xf32>
    %26 = vector.broadcast %cst_19 : f32 to vector<48x128xf32>
    %27 = arith.minimumf %26, %25 : vector<48x128xf32>
    %28 = arith.mulf %21, %27 : vector<48x128xf32>
    %cst_20 = arith.constant 0.166666672 : f32
    %29 = vector.broadcast %cst_20 : f32 to vector<48x128xf32>
    %30 = arith.mulf %28, %29 : vector<48x128xf32>
    %31 = arith.truncf %30 : vector<48x128xf32> to vector<48x128xbf16>
    %c0_21 = arith.constant 0 : index
    %c0_22 = arith.constant 0 : index
    %32 = vector.load %arg8[%c0_21, %c0_22] : memref<128x128xbf16, #tpu.memory_space<vmem>>, vector<128x128xbf16>
    %cst_23 = arith.constant dense<0.000000e+00> : vector<48x128xf32>
    %33 = tpu.matmul %31, %32, %cst_23 {dimension_numbers = #tpu.dot_dimension_numbers<[1], [0], [0], [1], [0, 0, 1, 1], [], []>} : vector<48x128xbf16>, vector<128x128xbf16>, vector<48x128xf32> -> vector<48x128xf32>
    %c0_24 = arith.constant 0 : index
    %c0_25 = arith.constant 0 : index
    %34 = vector.load %arg9[%c0_24, %c0_25] : memref<1x128xf32, #tpu.memory_space<vmem>>, vector<1x128xf32>
    %35 = vector.broadcast %34 : vector<1x128xf32> to vector<48x128xf32>
    %36 = arith.addf %33, %35 : vector<48x128xf32>
    %c0_26 = arith.constant 0 : index
    %c0_27 = arith.constant 0 : index
    %37 = vector.load %arg10[%c0_26, %c0_27] : memref<48x128xf32, #tpu.memory_space<vmem>>, vector<48x128xf32>
    tpu.vector_store %arg10[%c0_26, %c0_27], %36 {strides = array<i32>} : memref<48x128xf32, #tpu.memory_space<vmem>>, vector<48x128xf32>,
    return
  }
  func.func @transform_0(%arg0: i32) -> (i32, i32) {
    %c0_i32 = arith.constant 0 : i32
    %c0_i32_0 = arith.constant 0 : i32
    return %arg0, %c0_i32 : i32, i32
  }
  func.func @transform_1(%arg0: i32) -> (i32, i32) {
    %c0_i32 = arith.constant 0 : i32
    %c0_i32_0 = arith.constant 0 : i32
    %c0_i32_1 = arith.constant 0 : i32
    return %c0_i32, %c0_i32_0 : i32, i32
  }
  func.func @transform_2(%arg0: i32) -> (i32, i32) {
    %c0_i32 = arith.constant 0 : i32
    %c0_i32_0 = arith.constant 0 : i32
    %c0_i32_1 = arith.constant 0 : i32
    return %c0_i32, %c0_i32_0 : i32, i32
  }
  func.func @transform_3(%arg0: i32) -> (i32, i32) {
    %c0_i32 = arith.constant 0 : i32
    %c0_i32_0 = arith.constant 0 : i32
    %c0_i32_1 = arith.constant 0 : i32
    return %c0_i32, %c0_i32_0 : i32, i32
  }
  func.func @transform_4(%arg0: i32) -> (i32, i32) {
    %c0_i32 = arith.constant 0 : i32
    %c0_i32_0 = arith.constant 0 : i32
    %c0_i32_1 = arith.constant 0 : i32
    return %c0_i32, %c0_i32_0 : i32, i32
  }
  func.func @transform_5(%arg0: i32) -> (i32, i32) {
    %c0_i32 = arith.constant 0 : i32
    %c0_i32_0 = arith.constant 0 : i32
    %c0_i32_1 = arith.constant 0 : i32
    return %c0_i32, %c0_i32_0 : i32, i32
  }
  func.func @transform_6(%arg0: i32) -> (i32, i32) {
    %c0_i32 = arith.constant 0 : i32
    %c0_i32_0 = arith.constant 0 : i32
    %c0_i32_1 = arith.constant 0 : i32
    return %c0_i32, %c0_i32_0 : i32, i32
  }
  func.func @transform_7(%arg0: i32) -> (i32, i32) {
    %c0_i32 = arith.constant 0 : i32
    %c0_i32_0 = arith.constant 0 : i32
    %c0_i32_1 = arith.constant 0 : i32
    return %c0_i32, %c0_i32_0 : i32, i32
  }
  func.func @transform_8(%arg0: i32) -> (i32, i32) {
    %c0_i32 = arith.constant 0 : i32
    %c0_i32_0 = arith.constant 0 : i32
    %c0_i32_1 = arith.constant 0 : i32
    return %c0_i32, %c0_i32_0 : i32, i32
  }
  func.func @transform_9(%arg0: i32) -> (i32, i32) {
    %c0_i32 = arith.constant 0 : i32
    %c0_i32_0 = arith.constant 0 : i32
    return %arg0, %c0_i32 : i32, i32
  }
}

</mosaic_0001>

<bundles_post_ra>
// kernel: actor_ppo_forward.1
= control target key start
LH: loop header
LB: loop body
LE: loop exit
PB: predicated region body
PF: predicated region fallthrough
CT: control target
= control target key end

     0   :  { %v862_v0 = vmov 0.0   ;;  %vm863_vm0 = vmmov 0   ;;  %s1105_s1 = inlined_call_operand.vmem [shape: bf16[128,128], index: 1, kind: input, shape index: {}]   ;;  %s1106_s0 = inlined_call_operand.vmem [shape: bf16[48,128], index: 0, kind: input, shape index: {}]   ;;  %s1107_s3 = inlined_call_operand.vmem [shape: bf16[128,128], index: 3, kind: input, shape index: {}]   ;;  %s1108_s5 = inlined_call_operand.vmem [shape: bf16[128,128], index: 5, kind: input, shape index: {}]   ;;  %s1109_s2 = inlined_call_operand.vmem [shape: f32[1,128], index: 2, kind: input, shape index: {}]   ;;  %s1110_s7 = inlined_call_operand.vmem [shape: bf16[128,128], index: 7, kind: input, shape index: {}]   ;;  %s1111_s4 = inlined_call_operand.vmem [shape: f32[1,128], index: 4, kind: input, shape index: {}]   ;;  %s1112_s6 = inlined_call_operand.vmem [shape: f32[1,128], index: 6, kind: input, shape index: {}]   ;;  %s1113_s8 = inlined_call_operand.vmem [shape: f32[1,128], index: 8, kind: input, shape index: {}]   ;;  %s1114_s9 = inlined_call_operand.vmem [shape: f32[48,128], index: 9, kind: output, shape index: {}]  }
   0x1   :  { %713 = vmatprep.subr.bf16.mxu0 %v862_v0  ;;  %v827_v1 = vld [vmem:[%s1105_s1 + $0x38] sm:$0xff]   ;;  %729 = vmatprep.mubr.msk.bf16.mxu0 %vm863_vm0, %v862_v0  ;;  %v828_v2 = vld [vmem:[%s1105_s1 + $0x30] sm:$0xff]   ;;  %v829_v3 = vld [vmem:[%s1105_s1 + $0x28] sm:$0xff]  }
   0x2   :  { %741 = vmatprep.subr.bf16.mxu1 %v862_v0  ;;  %757 = vmatprep.mubr.msk.bf16.mxu1 %vm863_vm0, %v862_v0  ;;  %v830_v4 = vld [vmem:[%s1105_s1 + $0x20] sm:$0xff]   ;;  %v838_v5 = vld [vmem:[%s1107_s3 + $0x38] sm:$0xff]   ;;  %v839_v6 = vld [vmem:[%s1107_s3 + $0x30] sm:$0xff]  }
   0x3   :  { %714 = vmatpush3.bf16.msra.mxu0 %v827_v1  ;;  %742 = vmatpush3.bf16.msra.mxu1 %v838_v5  ;;  %v831_v7 = vld [vmem:[%s1105_s1 + $0x18] sm:$0xff]   ;;  %v840_v8 = vld [vmem:[%s1107_s3 + $0x28] sm:$0xff]   ;;  %v832_v9 = vld [vmem:[%s1105_s1 + $0x10] sm:$0xff]  }
   0x4   :  { %715 = vmatprep.subr.bf16.mxu0 %v862_v0  ;;  %743 = vmatprep.subr.bf16.mxu1 %v862_v0  ;;  %v841_v10 = vld [vmem:[%s1107_s3 + $0x20] sm:$0xff]   ;;  %v833_v11 = vld [vmem:[%s1105_s1 + $0x8] sm:$0xff]   ;;  %v842_v12 = vld [vmem:[%s1107_s3 + $0x18] sm:$0xff]  }
   0x5   :  { %v834_v13 = vld [vmem:[%s1105_s1] sm:$0xff]   ;;  %v836_v15 = vld [vmem:[%s1106_s0 + $0x8] sm:$0xff]   ;;  %v837_v16 = vld [vmem:[%s1106_s0 + $0x10] sm:$0xff]  }
   0x6   :  { %v835_v14 = vld [vmem:[%s1106_s0] sm:$0xff]   ;;  %v843_v17 = vld [vmem:[%s1107_s3 + $0x10] sm:$0xff]   ;;  %v844_v18 = vld [vmem:[%s1107_s3 + $0x8] sm:$0xff]  }
   0x7   :  { %716 = vmatpush3.bf16.msra.mxu0 %v828_v2  ;;  %744 = vmatpush3.bf16.msra.mxu1 %v839_v6  ;;  %v845_v19 = vld [vmem:[%s1107_s3] sm:$0xff]   ;;  %v846_v20 = vld [vmem:[%s1108_s5 + $0x38] sm:$0xff]   ;;  %v847_v21 = vld [vmem:[%s1108_s5 + $0x30] sm:$0xff]  }
   0x8   :  { %717 = vmatprep.subr.bf16.mxu0 %v862_v0  ;;  %745 = vmatprep.subr.bf16.mxu1 %v862_v0  ;;  %v848_v22 = vld [vmem:[%s1108_s5 + $0x28] sm:$0xff]   ;;  %v849_v23 = vld [vmem:[%s1108_s5 + $0x20] sm:$0xff]   ;;  %v850_v24 = vld [vmem:[%s1108_s5 + $0x18] sm:$0xff]  }
   0x9   :  { %v630_v25 = vld [vmem:[%s1109_s2] ss:$0 sm:$0xff]  ;;  %v851_v53 = vld [vmem:[%s1108_s5 + $0x10] sm:$0xff]   ;;  %v852_v54 = vld [vmem:[%s1108_s5 + $0x8] sm:$0xff]  }
   0xa   :  { %v853_v55 = vld [vmem:[%s1108_s5] sm:$0xff]   ;;  %v854_v56 = vld [vmem:[%s1110_s7 + $0x38] sm:$0xff]   ;;  %v855_v57 = vld [vmem:[%s1110_s7 + $0x30] sm:$0xff]  }
   0xb   :  { %718 = vmatpush3.bf16.msra.mxu0 %v829_v3  ;;  %746 = vmatpush3.bf16.msra.mxu1 %v840_v8  ;;  %v856_v58 = vld [vmem:[%s1110_s7 + $0x28] sm:$0xff]   ;;  %v642_v59 = vld [vmem:[%s1111_s4] ss:$0 sm:$0xff] }
   0xc   :  { %719 = vmatprep.subr.bf16.mxu0 %v862_v0  ;;  %747 = vmatprep.subr.bf16.mxu1 %v862_v0 }
   0xf   :  { %720 = vmatpush3.bf16.msra.mxu0 %v830_v4  ;;  %748 = vmatpush3.bf16.msra.mxu1 %v841_v10 }
  0x10   :  { %721 = vmatprep.subr.bf16.mxu0 %v862_v0  ;;  %749 = vmatprep.subr.bf16.mxu1 %v862_v0 }
  0x13   :  { %722 = vmatpush3.bf16.msra.mxu0 %v831_v7  ;;  %750 = vmatpush3.bf16.msra.mxu1 %v842_v12 }
  0x14   :  { %723 = vmatprep.subr.bf16.mxu0 %v862_v0  ;;  %751 = vmatprep.subr.bf16.mxu1 %v862_v0 }
  0x17   :  { %724 = vmatpush3.bf16.msra.mxu0 %v832_v9  ;;  %752 = vmatpush3.bf16.msra.mxu1 %v843_v17 }
  0x18   :  { %725 = vmatprep.subr.bf16.mxu0 %v862_v0  ;;  %753 = vmatprep.subr.bf16.mxu1 %v862_v0 }
  0x1b   :  { %726 = vmatpush3.bf16.msra.mxu0 %v833_v11  ;;  %754 = vmatpush3.bf16.msra.mxu1 %v844_v18 }
  0x1c   :  { %727 = vmatprep.subr.bf16.mxu0 %v862_v0  ;;  %755 = vmatprep.subr.bf16.mxu1 %v862_v0 }
  0x1f   :  { %728 = vmatpush3.bf16.msra.mxu0 %v834_v13  ;;  %756 = vmatpush3.bf16.msra.mxu1 %v845_v19 }
  0x20   :  { %769 = vmatprep.subr.bf16.mxu0 %v862_v0  ;;  %797 = vmatprep.subr.bf16.mxu1 %v862_v0 }
  0x22   :  { %730 = vmatmul.mubr.bf16.vlgmr.msra.gmra.mxu0 %v835_v14 }
  0x23   :  { %733 = vmatprep.mubr.msk.bf16.mxu0 %vm863_vm0, %v862_v0  ;;  %770 = vmatpush3.bf16.msra.mxu0 %v846_v20 }
  0x24   :  { %771 = vmatprep.subr.bf16.mxu0 %v862_v0 }
  0x27   :  { %772 = vmatpush3.bf16.msra.mxu0 %v847_v21 }
  0x28   :  { %773 = vmatprep.subr.bf16.mxu0 %v862_v0 }
  0x2a   :  { %734 = vmatmul.mubr.bf16.gmra.mxu0 %v836_v15 }
  0x2b   :  { %737 = vmatprep.mubr.msk.bf16.mxu0 %vm863_vm0, %v862_v0  ;;  %774 = vmatpush3.bf16.msra.mxu0 %v848_v22 }
  0x2c   :  { %775 = vmatprep.subr.bf16.mxu0 %v862_v0 }
  0x2f   :  { %776 = vmatpush3.bf16.msra.mxu0 %v849_v23 }
  0x30   :  { %777 = vmatprep.subr.bf16.mxu0 %v862_v0 }
  0x32   :  { %738 = vmatmul.mubr.bf16.gmra.mxu0 %v837_v16 }
  0x33   :  { %785 = vmatprep.mubr.msk.bf16.mxu0 %vm863_vm0, %v862_v0  ;;  %778 = vmatpush3.bf16.msra.mxu0 %v850_v24  ;;  %v857_v24 = vld [vmem:[%s1110_s7 + $0x20] sm:$0xff]  }
  0x34   :  { %779 = vmatprep.subr.bf16.mxu0 %v862_v0 }
  0x37   :  { %780 = vmatpush3.bf16.msra.mxu0 %v851_v53 }
  0x38   :  { %781 = vmatprep.subr.bf16.mxu0 %v862_v0 }
  0x3b   :  { %782 = vmatpush3.bf16.msra.mxu0 %v852_v54 }
  0x3c   :  { %783 = vmatprep.subr.bf16.mxu0 %v862_v0 }
  0x3f   :  { %784 = vmatpush3.bf16.msra.mxu0 %v853_v55 }
  0xe2   :  { %v162_v26 = vpop.f32.mrf.mxu0 }
  0xe3   :  { %v163_v28 = vadd.f32 %v630_v25, %v162_v26  ;;  %v859_v26 = vld [vmem:[%s1110_s7 + $0x10] sm:$0xff]  }
  0xe4   :  { %v731_v27 = vpop.f32.mrf.mxu0 }
  0xe5   :  { %v185_v32 = vmax.f32 %v163_v28, 0.0  ;;  %v860_v27 = vld [vmem:[%s1110_s7 + $0x8] sm:$0xff]   ;;  %v861_v28 = vld [vmem:[%s1110_s7] sm:$0xff]  }
  0xe6   :  { %v165_v29 = vpop.f32.mrf.mxu0 }
  0xe7   :  { %v166_v30 = vadd.f32 %v630_v25, %v165_v29  ;;  %v651_v29 = vld [vmem:[%s1112_s6] ss:$0 sm:$0xff] }
  0xe8   :  { %v732_v31 = vpop.f32.mrf.mxu0 }
  0xe9   :  { %v186_v33 = vmax.f32 %v166_v30, 0.0 }
  0xea   :  { %v170_v34 = vpop.f32.mrf.mxu0 }
  0xeb   :  { %v191_v35 = vpack.c.bf16 %v186_v33, %v185_v32  ;;  %v171_v37 = vadd.f32 %v630_v25, %v170_v34 }
  0xec   :  { %v735_v36 = vpop.f32.mrf.mxu0 }
  0xed   :  { %758 = vmatmul.mubr.bf16.vlgmr.msra.gmra.mxu1 %v191_v35  ;;  %v187_v41 = vmax.f32 %v171_v37, 0.0 }
  0xee   :  { %v173_v38 = vpop.f32.mrf.mxu0  ;;  %761 = vmatprep.mubr.msk.bf16.mxu1 %vm863_vm0, %v862_v0  ;;  %798 = vmatpush3.bf16.msra.mxu1 %v854_v56 }
  0xef   :  { %v174_v39 = vadd.f32 %v630_v25, %v173_v38  ;;  %799 = vmatprep.subr.bf16.mxu1 %v862_v0 }
  0xf0   :  { %v736_v40 = vpop.f32.mrf.mxu0 }
  0xf1   :  { %v188_v42 = vmax.f32 %v174_v39, 0.0 }
  0xf2   :  { %v178_v43 = vpop.f32.mrf.mxu0  ;;  %800 = vmatpush3.bf16.msra.mxu1 %v855_v57 }
  0xf3   :  { %v192_v44 = vpack.c.bf16 %v188_v42, %v187_v41  ;;  %v179_v46 = vadd.f32 %v630_v25, %v178_v43  ;;  %801 = vmatprep.subr.bf16.mxu1 %v862_v0 }
  0xf4   :  { %v739_v45 = vpop.f32.mrf.mxu0 }
  0xf5   :  { %762 = vmatmul.mubr.bf16.gmra.mxu1 %v192_v44  ;;  %v189_v50 = vmax.f32 %v179_v46, 0.0 }
  0xf6   :  { %v181_v47 = vpop.f32.mrf.mxu0  ;;  %765 = vmatprep.mubr.msk.bf16.mxu1 %vm863_vm0, %v862_v0  ;;  %802 = vmatpush3.bf16.msra.mxu1 %v856_v58 }
  0xf7   :  { %v182_v48 = vadd.f32 %v630_v25, %v181_v47  ;;  %803 = vmatprep.subr.bf16.mxu1 %v862_v0  ;;  %v858_v25 = vld [vmem:[%s1110_s7 + $0x18] sm:$0xff]  }
  0xf8   :  { %v740_v49 = vpop.f32.mrf.mxu0 }
  0xf9   :  { %v190_v51 = vmax.f32 %v182_v48, 0.0 }
  0xfa   :  { %804 = vmatpush3.bf16.msra.mxu1 %v857_v24 }
  0xfb   :  { %v193_v52 = vpack.c.bf16 %v190_v51, %v189_v50  ;;  %805 = vmatprep.subr.bf16.mxu1 %v862_v0 }
  0xfd   :  { %766 = vmatmul.mubr.bf16.gmra.mxu1 %v193_v52 }
  0xfe   :  { %813 = vmatprep.mubr.msk.bf16.mxu1 %vm863_vm0, %v862_v0  ;;  %806 = vmatpush3.bf16.msra.mxu1 %v858_v25 }
  0xff   :  { %807 = vmatprep.subr.bf16.mxu1 %v862_v0 }
 0x102   :  { %808 = vmatpush3.bf16.msra.mxu1 %v859_v26 }
 0x103   :  { %809 = vmatprep.subr.bf16.mxu1 %v862_v0 }
 0x106   :  { %810 = vmatpush3.bf16.msra.mxu1 %v860_v27 }
 0x107   :  { %811 = vmatprep.subr.bf16.mxu1 %v862_v0 }
 0x10a   :  { %812 = vmatpush3.bf16.msra.mxu1 %v861_v28 }
 0x1ad   :  { %v299_v60 = vpop.f32.mrf.mxu1 }
 0x1ae   :  { %v300_v62 = vadd.f32 %v642_v59, %v299_v60 }
 0x1af   :  { %v759_v61 = vpop.f32.mrf.mxu1 }
 0x1b0   :  { %v322_v3 = vmax.f32 %v300_v62, 0.0 }
 0x1b1   :  { %v302_v63 = vpop.f32.mrf.mxu1 }
 0x1b2   :  { %v303_v1 = vadd.f32 %v642_v59, %v302_v63 }
 0x1b3   :  { %v760_v2 = vpop.f32.mrf.mxu1 }
 0x1b4   :  { %v323_v4 = vmax.f32 %v303_v1, 0.0 }
 0x1b5   :  { %v307_v5 = vpop.f32.mrf.mxu1 }
 0x1b6   :  { %v328_v6 = vpack.c.bf16 %v323_v4, %v322_v3  ;;  %v308_v8 = vadd.f32 %v642_v59, %v307_v5 }
 0x1b7   :  { %v763_v7 = vpop.f32.mrf.mxu1 }
 0x1b8   :  { %786 = vmatmul.mubr.bf16.vlgmr.msra.gmra.mxu0 %v328_v6  ;;  %v324_v12 = vmax.f32 %v308_v8, 0.0 }
 0x1b9   :  { %v310_v9 = vpop.f32.mrf.mxu1  ;;  %789 = vmatprep.mubr.msk.bf16.mxu0 %vm863_vm0, %v862_v0 }
 0x1ba   :  { %v311_v10 = vadd.f32 %v642_v59, %v310_v9 }
 0x1bb   :  { %v764_v11 = vpop.f32.mrf.mxu1 }
 0x1bc   :  { %v325_v13 = vmax.f32 %v311_v10, 0.0 }
 0x1bd   :  { %v315_v14 = vpop.f32.mrf.mxu1 }
 0x1be   :  { %v329_v15 = vpack.c.bf16 %v325_v13, %v324_v12  ;;  %v316_v17 = vadd.f32 %v642_v59, %v315_v14 }
 0x1bf   :  { %v767_v16 = vpop.f32.mrf.mxu1 }
 0x1c0   :  { %790 = vmatmul.mubr.bf16.gmra.mxu0 %v329_v15  ;;  %v326_v21 = vmax.f32 %v316_v17, 0.0 }
 0x1c1   :  { %v318_v18 = vpop.f32.mrf.mxu1  ;;  %793 = vmatprep.mubr.msk.bf16.mxu0 %vm863_vm0, %v862_v0 }
 0x1c2   :  { %v319_v19 = vadd.f32 %v642_v59, %v318_v18  ;;  %v660_v18 = vld [vmem:[%s1113_s8] ss:$0 sm:$0xff] }
 0x1c3   :  { %v768_v20 = vpop.f32.mrf.mxu1 }
 0x1c4   :  { %v327_v22 = vmax.f32 %v319_v19, 0.0 }
 0x1c6   :  { %v330_v23 = vpack.c.bf16 %v327_v22, %v326_v21 }
 0x1c8   :  { %794 = vmatmul.mubr.bf16.gmra.mxu0 %v330_v23 }
 0x278   :  { %v436_v30 = vpop.f32.mrf.mxu0 }
 0x279   :  { %v437_v31 = vadd.f32 %v651_v29, %v436_v30 }
 0x27a   :  { %v787_v32 = vpop.f32.mrf.mxu0 }
 0x27b   :  { %v459_v33 = vadd.f32 3.0, %v437_v31 }
 0x27c   :  { %v439_v34 = vpop.f32.mrf.mxu0 }
 0x27d   :  { %v465_v35 = vmax.f32 %v459_v33, 0.0  ;;  %v440_v36 = vadd.f32 %v651_v29, %v439_v34 }
 0x27e   :  { %v788_v37 = vpop.f32.mrf.mxu0 }
 0x27f   :  { %v471_v38 = vmin.f32 %v465_v35, 6.0  ;;  %v460_v39 = vadd.f32 3.0, %v440_v36 }
 0x280   :  { %v444_v40 = vpop.f32.mrf.mxu0 }
 0x281   :  { %v466_v41 = vmax.f32 %v460_v39, 0.0  ;;  %v445_v42 = vadd.f32 %v651_v29, %v444_v40  ;;  %v477_v44 = vmul.f32 %v471_v38, %v437_v31 }
 0x282   :  { %v791_v43 = vpop.f32.mrf.mxu0 }
 0x283   :  { %v472_v45 = vmin.f32 %v466_v41, 6.0  ;;  %v461_v46 = vadd.f32 3.0, %v445_v42  ;;  %v483_v52 = vmul.f32 0.16666667, %v477_v44 }
 0x284   :  { %v447_v47 = vpop.f32.mrf.mxu0 }
 0x285   :  { %v478_v48 = vmul.f32 %v472_v45, %v440_v36  ;;  %v467_v49 = vmax.f32 %v461_v46, 0.0  ;;  %v448_v50 = vadd.f32 %v651_v29, %v447_v47 }
 0x286   :  { %v792_v51 = vpop.f32.mrf.mxu0 }
 0x287   :  { %v484_v53 = vmul.f32 0.16666667, %v478_v48  ;;  %v473_v54 = vmin.f32 %v467_v49, 6.0  ;;  %v462_v55 = vadd.f32 3.0, %v448_v50 }
 0x288   :  { %v452_v56 = vpop.f32.mrf.mxu0 }
 0x289   :  { %v489_v57 = vpack.c.bf16 %v484_v53, %v483_v52  ;;  %v468_v58 = vmax.f32 %v462_v55, 0.0  ;;  %v453_v59 = vadd.f32 %v651_v29, %v452_v56  ;;  %v479_v61 = vmul.f32 %v473_v54, %v445_v42 }
 0x28a   :  { %v795_v60 = vpop.f32.mrf.mxu0 }
 0x28b   :  { %v474_v62 = vmin.f32 %v468_v58, 6.0  ;;  %v463_v63 = vadd.f32 3.0, %v453_v59  ;;  %814 = vmatmul.mubr.bf16.vlgmr.msra.gmra.mxu1 %v489_v57  ;;  %v485_v6 = vmul.f32 0.16666667, %v479_v61 }
 0x28c   :  { %v455_v1 = vpop.f32.mrf.mxu0  ;;  %817 = vmatprep.mubr.msk.bf16.mxu1 %vm863_vm0, %v862_v0 }
 0x28d   :  { %v480_v2 = vmul.f32 %v474_v62, %v448_v50  ;;  %v469_v3 = vmax.f32 %v463_v63, 0.0  ;;  %v456_v4 = vadd.f32 %v651_v29, %v455_v1 }
 0x28e   :  { %v796_v5 = vpop.f32.mrf.mxu0 }
 0x28f   :  { %v486_v7 = vmul.f32 0.16666667, %v480_v2  ;;  %v475_v8 = vmin.f32 %v469_v3, 6.0  ;;  %v464_v9 = vadd.f32 3.0, %v456_v4 }
 0x291   :  { %v470_v10 = vmax.f32 %v464_v9, 0.0  ;;  %v490_v11 = vpack.c.bf16 %v486_v7, %v485_v6  ;;  %v481_v12 = vmul.f32 %v475_v8, %v453_v59 }
 0x293   :  { %v476_v13 = vmin.f32 %v470_v10, 6.0  ;;  %818 = vmatmul.mubr.bf16.gmra.mxu1 %v490_v11  ;;  %v487_v15 = vmul.f32 0.16666667, %v481_v12 }
 0x294   :  { %821 = vmatprep.mubr.msk.bf16.mxu1 %vm863_vm0, %v862_v0 }
 0x295   :  { %v482_v14 = vmul.f32 %v476_v13, %v456_v4 }
 0x297   :  { %v488_v16 = vmul.f32 0.16666667, %v482_v14 }
 0x299   :  { %v491_v17 = vpack.c.bf16 %v488_v16, %v487_v15 }
 0x29b   :  { %822 = vmatmul.mubr.bf16.gmra.mxu1 %v491_v17 }
 0x34b   :  { %v597_v19 = vpop.f32.mrf.mxu1 }
 0x34c   :  { %v598_v20 = vadd.f32 %v660_v18, %v597_v19 }
 0x34d   :  { %v815_v21 = vpop.f32.mrf.mxu1 }
 0x34e   :  { %620 = vst [vmem:[%s1114_s9] sm:$0xff] %v598_v20 }
 0x34f   :  { %v600_v22 = vpop.f32.mrf.mxu1 }
 0x350   :  { %v601_v23 = vadd.f32 %v660_v18, %v600_v22 }
 0x351   :  { %v816_v24 = vpop.f32.mrf.mxu1 }
 0x352   :  { %621 = vst [vmem:[%s1114_s9 + $0x8] sm:$0xff] %v601_v23 }
 0x353   :  { %v605_v0 = vpop.f32.mrf.mxu1 }
 0x354   :  { %v606_v25 = vadd.f32 %v660_v18, %v605_v0 }
 0x355   :  { %v819_v26 = vpop.f32.mrf.mxu1 }
 0x356   :  { %622 = vst [vmem:[%s1114_s9 + $0x10] sm:$0xff] %v606_v25 }
 0x357   :  { %v608_v27 = vpop.f32.mrf.mxu1 }
 0x358   :  { %v609_v28 = vadd.f32 %v660_v18, %v608_v27 }
 0x359   :  { %v820_v29 = vpop.f32.mrf.mxu1 }
 0x35a   :  { %623 = vst [vmem:[%s1114_s9 + $0x18] sm:$0xff] %v609_v28 }
 0x35b   :  { %v613_v30 = vpop.f32.mrf.mxu1 }
 0x35c   :  { %v614_v31 = vadd.f32 %v660_v18, %v613_v30 }
 0x35d   :  { %v823_v32 = vpop.f32.mrf.mxu1 }
 0x35e   :  { %624 = vst [vmem:[%s1114_s9 + $0x20] sm:$0xff] %v614_v31 }
 0x35f   :  { %v616_v33 = vpop.f32.mrf.mxu1 }
 0x360   :  { %v617_v34 = vadd.f32 %v660_v18, %v616_v33 }
 0x361   :  { %v824_v35 = vpop.f32.mrf.mxu1 }
 0x362   :  { %625 = vst [vmem:[%s1114_s9 + $0x28] sm:$0xff] %v617_v34 }

</bundles_post_ra>
